<compile_context>
chip_gen: v7x
topology: tpu7x:2x2x1
jax: 0.10.0
libtpu: 0.0.40
codegen_flags: <defaults>
</compile_context>

<pallas_src>
import jax
import jax.numpy as jnp
from jax import lax
from jax.experimental import pallas as pl
from jax.experimental.pallas import tpu as pltpu


def _round_up(x, m):
    return (x + m - 1) // m * m


def _sublane_multiple(dtype):
    # dtype-aware second-to-last-dim packing: f32 -> 8, bf16 -> 16, int8/fp8 -> 32.
    return {4: 8, 2: 16, 1: 32}.get(jnp.dtype(dtype).itemsize, 8)


def _pick_block(dim_pad, pref):
    """Largest multiple of 128 that divides dim_pad (itself a 128-multiple) and <= pref."""
    if dim_pad <= pref:
        return dim_pad
    t = pref - pref % 128
    while t >= 128:
        if dim_pad % t == 0:
            return t
        t -= 128
    return 128


def _default_tile_m():
    # Arithmetic-intensity target per generation (FLOPs per weight byte ~ tm):
    #   v5e ridge ~240 FLOPs/B -> 256; v6e ridge ~650 -> 768; v7x ridge ~310 -> 512.
    try:
        kind = jax.devices()[0].device_kind.lower()
    except Exception:
        kind = ""
    if "v5" in kind:
        return 256
    if "v6" in kind:
        return 768
    if "v7" in kind:
        return 512
    return 512


# ----------------------------- kernels -----------------------------------------------

def _col_linear_kernel_k1(shard_ids_ref, x_ref, w_ref, b_ref, o_ref):
    # Single-K-step fast path: one MXU pass per output tile, no accumulator scratch.
    # x_ref: [tm, K_pad] bf16, w_ref: [K_pad, tn] bf16, b_ref: [1, tn] f32
    acc = jnp.dot(x_ref[...], w_ref[...], preferred_element_type=jnp.float32)
    o_ref[...] = (acc + b_ref[...].astype(jnp.float32)).astype(o_ref.dtype)


def _col_linear_kernel(shard_ids_ref, x_ref, w_ref, b_ref, o_ref, acc_ref):
    # Multi-K-step path: f32 VMEM accumulator resident across the K axis.
    ki = pl.program_id(3)

    @pl.when(ki == 0)
    def _():
        acc_ref[...] = jnp.zeros_like(acc_ref)

    acc_ref[...] += jnp.dot(x_ref[...], w_ref[...], preferred_element_type=jnp.float32)

    @pl.when(ki == pl.num_programs(3) - 1)
    def _():
        o_ref[...] = (acc_ref[...] + b_ref[...].astype(jnp.float32)).astype(o_ref.dtype)


# ----------------------------- one-time parameter prep -------------------------------

def prepare_col_parallel_params(weight_shards, bias_shards=None, *,
                                compute_dtype=jnp.bfloat16,
                                tn=512, tk=512, k_single_step_max=2048):
    """One-time parameter preparation (call at module init, NOT every forward step).

    weight_shards: [tp, N_local, K]   (nn.Linear layout, one shard per TP rank)
    bias_shards  : [tp, N_local] or None
    """
    tp, n_local, k = weight_shards.shape
    if compute_dtype is None:
        compute_dtype = weight_shards.dtype

    k_pad = _round_up(k, 128)
    n_pad = _round_up(n_local, 128)

    # Single-K-step fast path when the whole (padded) contraction fits in VMEM tiles.
    if k_pad <= k_single_step_max:
        tk = k_pad
    else:
        tk = _pick_block(k_pad, tk)
    tn = _pick_block(n_pad, tn)

    w = weight_shards
    if (n_pad, k_pad) != (n_local, k):
        w = jnp.pad(w, ((0, 0), (0, n_pad - n_local), (0, k_pad - k)))
    # K-major layout so the kernel does a plain [M,K] x [K,N] contraction.
    w = jnp.transpose(w, (0, 2, 1)).astype(compute_dtype)          # [tp, K_pad, N_pad]

    if bias_shards is None:
        b = jnp.zeros((tp, n_local), dtype=jnp.float32)
    else:
        b = bias_shards.astype(jnp.float32)
    if n_pad != n_local:
        b = jnp.pad(b, ((0, 0), (0, n_pad - n_local)))
    b = b.reshape(tp, 1, n_pad)                                     # f32 bias

    return dict(w=w, b=b, tp=tp, n_local=n_local, k=k,
                k_pad=k_pad, n_pad=n_pad, tk=tk, tn=tn,
                compute_dtype=jnp.dtype(compute_dtype))


# ----------------------------- forward ------------------------------------------------

def col_parallel_linear(x, params, *, gather_output=True, rank=0, tm=None):
    """x: [..., K]. Returns [..., tp*N_local] if gather_output else [..., N_local]."""
    w, b = params["w"], params["b"]
    tp, n_local, k = params["tp"], params["n_local"], params["k"]
    k_pad, n_pad = params["k_pad"], params["n_pad"]
    tk, tn = params["tk"], params["tn"]
    compute_dtype = params["compute_dtype"]
    out_dtype = x.dtype

    *lead, k_x = x.shape
    assert k_x == k, f"expected last dim {k}, got {k_x}"
    m = 1
    for d in lead:
        m *= d

    # dtype-aware sublane rounding of the M tile.
    sub = _sublane_multiple(compute_dtype)
    if tm is None:
        tm = _default_tile_m()
    tm = _round_up(min(tm, _round_up(m, sub)), sub)
    m_pad = _round_up(m, tm)

    x2d = x.reshape(m, k).astype(compute_dtype)
    if (m_pad, k_pad) != (m, k):
        x2d = jnp.pad(x2d, ((0, m_pad - m), (0, k_pad - k)))

    if gather_output:
        # TODO(synk): this is a single-chip emulation of the all-gather (each shard
        # writes its own column block of one output buffer); under real TP sharding use
        # make_async_remote_copy + barrier semaphores or an XLA all-gather outside.
        tp_eff = tp
        shard_ids = jnp.arange(tp, dtype=jnp.int32)
    else:
        tp_eff = 1
        shard_ids = jnp.asarray([rank], dtype=jnp.int32).reshape(1)

    m_tiles = m_pad // tm
    n_tiles = n_pad // tn
    k_tiles = k_pad // tk

    csize = compute_dtype.itemsize
    osize = jnp.dtype(out_dtype).itemsize
    # Explicit VMEM budget: double-buffered x / w / bias / out tiles (+ f32 accumulator).
    need = 2 * (tm * tk * csize + tk * tn * csize + 8 * tn * 4 + tm * tn * osize)
    if k_tiles > 1:
        need += tm * tn * 4
    vmem_limit = int(min(max(2 * need + (8 << 20), 32 << 20), 64 << 20))

    cost = pl.CostEstimate(
        flops=2 * m_pad * k_pad * n_pad * tp_eff,
        transcendentals=0,
        bytes_accessed=(m_pad * k_pad * csize
                        + tp_eff * k_pad * n_pad * csize
                        + m_pad * tp_eff * n_pad * osize),
    )

    out_shape = jax.ShapeDtypeStruct((m_pad, tp_eff * n_pad), out_dtype)

    # NOTE: grid order is (shard, M, N[, K]). If the workload is ever activation-
    # dominated (huge M, tiny N_local per shard), swap the M and N axes so the larger
    # operand stays resident across the inner sweep.
    if k_tiles == 1:
        grid_spec = pltpu.PrefetchScalarGridSpec(
            num_scalar_prefetch=1,
            grid=(tp_eff, m_tiles, n_tiles),
            in_specs=[
                pl.BlockSpec((tm, k_pad), lambda r, mi, ni, sids: (mi, 0)),
                pl.BlockSpec((None, k_pad, tn),
                             lambda r, mi, ni, sids: (sids[r], 0, ni)),
                pl.BlockSpec((None, 1, tn),
                             lambda r, mi, ni, sids: (sids[r], 0, ni)),
            ],
            out_specs=pl.BlockSpec(
                (tm, tn),
                lambda r, mi, ni, sids, _nt=n_tiles: (mi, r * _nt + ni)),
        )
        kernel = _col_linear_kernel_k1
        dims = ("parallel", "parallel", "parallel")
    else:
        grid_spec = pltpu.PrefetchScalarGridSpec(
            num_scalar_prefetch=1,
            grid=(tp_eff, m_tiles, n_tiles, k_tiles),
            in_specs=[
                pl.BlockSpec((tm, tk), lambda r, mi, ni, ki, sids: (mi, ki)),
                pl.BlockSpec((None, tk, tn),
                             lambda r, mi, ni, ki, sids: (sids[r], ki, ni)),
                pl.BlockSpec((None, 1, tn),
                             lambda r, mi, ni, ki, sids: (sids[r], 0, ni)),
            ],
            out_specs=pl.BlockSpec(
                (tm, tn),
                lambda r, mi, ni, ki, sids, _nt=n_tiles: (mi, r * _nt + ni)),
            scratch_shapes=[pltpu.VMEM((tm, tn), jnp.float32)],
        )
        kernel = _col_linear_kernel
        dims = ("parallel", "parallel", "parallel", "arbitrary")

    out = pl.pallas_call(
        kernel,
        out_shape=out_shape,
        grid_spec=grid_spec,
        compiler_params=pltpu.CompilerParams(
            dimension_semantics=dims,
            vmem_limit_bytes=vmem_limit),
        cost_estimate=cost,
    )(shard_ids, x2d, w, b)

    # Strip padding: shard r occupies columns [r*n_pad, (r+1)*n_pad) of the padded output.
    out = out[:m].reshape(m, tp_eff, n_pad)[:, :, :n_local].reshape(m, tp_eff * n_local)
    return out.reshape(*lead, tp_eff * n_local)


# ----------------------------- demo / correctness check ------------------------------

if __name__ == "__main__":
    key = jax.random.PRNGKey(0)
    kx, kw, kb, kx2, kw2, kb2 = jax.random.split(key, 6)

    # ---- Case 1: small hidden (single-K-step kernel), gather_output True & False ----
    batch, seq, in_features = 2, 8, 32
    tp_world_size = 2
    out_features = 256
    local_out = out_features // tp_world_size        # 128 per shard (lane-aligned)

    x = jax.random.normal(kx, (batch, seq, in_features), dtype=jnp.float32)
    weight_shards = 0.05 * jax.random.normal(
        kw, (tp_world_size, local_out, in_features), dtype=jnp.float32)
    bias_shards = 0.1 * jax.random.normal(
        kb, (tp_world_size, local_out), dtype=jnp.float32)

    params = prepare_col_parallel_params(weight_shards, bias_shards)   # bf16 MXU, once

    out = jax.block_until_ready(col_parallel_linear(x, params, gather_output=True))
    assert out.shape == (batch, seq, out_features)

    # Reference using the same bf16-quantized inputs with f32 accumulation.
    xr = x.astype(jnp.bfloat16).astype(jnp.float32)
    wr = weight_shards.astype(jnp.bfloat16).astype(jnp.float32)
    ref = jnp.concatenate(
        [jnp.einsum("bsk,nk->bsn", xr, wr[r], precision=lax.Precision.HIGHEST)
         + bias_shards[r] for r in range(tp_world_size)], axis=-1)
    assert jnp.allclose(out, ref, atol=2e-2, rtol=2e-2), \
        float(jnp.max(jnp.abs(out - ref)))

    out_local = jax.block_until_ready(
        col_parallel_linear(x, params, gather_output=False, rank=1))
    ref_local = (jnp.einsum("bsk,nk->bsn", xr, wr[1],
                            precision=lax.Precision.HIGHEST) + bias_shards[1])
    assert out_local.shape == (batch, seq, local_out)
    assert jnp.allclose(out_local, ref_local, atol=2e-2, rtol=2e-2)

    # ---- Case 2: larger K, force the multi-K-step accumulator kernel ----------------
    in2, out2 = 1024, 256
    local2 = out2 // tp_world_size
    x2 = jax.random.normal(kx2, (batch, seq, in2), dtype=jnp.float32)
    w2 = 0.05 * jax.random.normal(kw2, (tp_world_size, local2, in2), dtype=jnp.float32)
    b2 = 0.1 * jax.random.normal(kb2, (tp_world_size, local2), dtype=jnp.float32)
    params2 = prepare_col_parallel_params(w2, b2, k_single_step_max=512)  # tk=512, 2 K steps

    out2g = jax.block_until_ready(col_parallel_linear(x2, params2, gather_output=True))
    x2r = x2.astype(jnp.bfloat16).astype(jnp.float32)
    w2r = w2.astype(jnp.bfloat16).astype(jnp.float32)
    ref2 = jnp.concatenate(
        [jnp.einsum("bsk,nk->bsn", x2r, w2r[r], precision=lax.Precision.HIGHEST) + b2[r]
         for r in range(tp_world_size)], axis=-1)
    assert out2g.shape == (batch, seq, out2)
    assert jnp.allclose(out2g, ref2, atol=5e-2, rtol=5e-2), \
        float(jnp.max(jnp.abs(out2g - ref2)))

    print("KERNEL_OK")
</pallas_src>

<mosaic_0001>
module attributes {stable_mosaic.version = 11 : i64} {
  func.func @_col_linear_kernel_k1(%arg0: i32, %arg1: i32, %arg2: i32, %arg3: memref<2xi32, #tpu.memory_space<smem>>, %arg4: memref<16x128xbf16, #tpu.memory_space<vmem>>, %arg5: memref<1x128x128xbf16, #tpu.memory_space<vmem>>, %arg6: memref<1x1x128xf32, #tpu.memory_space<vmem>>, %arg7: memref<16x128xf32, #tpu.memory_space<vmem>>) attributes {dimension_semantics = [#tpu.dimension_semantics<parallel>, #tpu.dimension_semantics<parallel>, #tpu.dimension_semantics<parallel>], iteration_bounds = array<i64: 2, 1, 1>, scalar_prefetch = 1 : i64, scratch_operands = 0 : i64, tpu.core_type = #tpu.core_type<tc>, window_params = [{transform_indices = @transform_0, window_bounds = array<i64: 16, 128>}, {transform_indices = @transform_1, window_bounds = array<i64: 1, 128, 128>}, {transform_indices = @transform_2, window_bounds = array<i64: 1, 1, 128>}, {transform_indices = @transform_3, window_bounds = array<i64: 16, 128>}]} {
    %c0 = arith.constant 0 : index
    %c0_0 = arith.constant 0 : index
    %0 = vector.load %arg4[%c0, %c0_0] : memref<16x128xbf16, #tpu.memory_space<vmem>>, vector<16x128xbf16>
    %c0_1 = arith.constant 0 : index
    %c0_2 = arith.constant 0 : index
    %c0_3 = arith.constant 0 : index
    %1 = vector.load %arg5[%c0_1, %c0_2, %c0_3] : memref<1x128x128xbf16, #tpu.memory_space<vmem>>, vector<1x128x128xbf16>
    %2 = vector.shape_cast %1 : vector<1x128x128xbf16> to vector<128x128xbf16>
    %cst = arith.constant dense<0.000000e+00> : vector<16x128xf32>
    %3 = tpu.matmul %0, %2, %cst {dimension_numbers = #tpu.dot_dimension_numbers<[1], [0], [0], [1], [0, 0, 1, 1], [], []>} : vector<16x128xbf16>, vector<128x128xbf16>, vector<16x128xf32> -> vector<16x128xf32>
    %c0_4 = arith.constant 0 : index
    %c0_5 = arith.constant 0 : index
    %c0_6 = arith.constant 0 : index
    %4 = vector.load %arg6[%c0_4, %c0_5, %c0_6] : memref<1x1x128xf32, #tpu.memory_space<vmem>>, vector<1x1x128xf32>
    %5 = vector.shape_cast %4 : vector<1x1x128xf32> to vector<1x128xf32>
    %6 = vector.broadcast %5 : vector<1x128xf32> to vector<16x128xf32>
    %7 = arith.addf %3, %6 : vector<16x128xf32>
    %c0_7 = arith.constant 0 : index
    %c0_8 = arith.constant 0 : index
    %8 = vector.load %arg7[%c0_7, %c0_8] : memref<16x128xf32, #tpu.memory_space<vmem>>, vector<16x128xf32>
    tpu.vector_store %arg7[%c0_7, %c0_8], %7 {strides = array<i32>} : memref<16x128xf32, #tpu.memory_space<vmem>>, vector<16x128xf32>,
    return
  }
  func.func @transform_0(%arg0: i32, %arg1: i32, %arg2: i32, %arg3: memref<2xi32, #tpu.memory_space<smem>>) -> (i32, i32) {
    %c0_i32 = arith.constant 0 : i32
    %c0_i32_0 = arith.constant 0 : i32
    return %arg1, %c0_i32 : i32, i32
  }
  func.func @transform_1(%arg0: i32, %arg1: i32, %arg2: i32, %arg3: memref<2xi32, #tpu.memory_space<smem>>) -> (i32, i32, i32) {
    %0 = arith.index_cast %arg0 : i32 to index
    %1 = memref.load %arg3[%0] : memref<2xi32, #tpu.memory_space<smem>>
    %c0_i32 = arith.constant 0 : i32
    %c0_i32_0 = arith.constant 0 : i32
    return %1, %c0_i32, %arg2 : i32, i32, i32
  }
  func.func @transform_2(%arg0: i32, %arg1: i32, %arg2: i32, %arg3: memref<2xi32, #tpu.memory_space<smem>>) -> (i32, i32, i32) {
    %0 = arith.index_cast %arg0 : i32 to index
    %1 = memref.load %arg3[%0] : memref<2xi32, #tpu.memory_space<smem>>
    %c0_i32 = arith.constant 0 : i32
    %c0_i32_0 = arith.constant 0 : i32
    return %1, %c0_i32, %arg2 : i32, i32, i32
  }
  func.func @transform_3(%arg0: i32, %arg1: i32, %arg2: i32, %arg3: memref<2xi32, #tpu.memory_space<smem>>) -> (i32, i32) {
    %c1_i32 = arith.constant 1 : i32
    %0 = arith.muli %arg0, %c1_i32 : i32
    %1 = arith.addi %0, %arg2 : i32
    %c0_i32 = arith.constant 0 : i32
    return %arg1, %1 : i32, i32
  }
}

</mosaic_0001>

<bundles_post_ra>
// kernel: tpu_custom_call.1
= control target key start
LH: loop header
LB: loop body
LE: loop exit
PB: predicated region body
PF: predicated region fallthrough
CT: control target
= control target key end

     0   :  { %s1186_s0 = inlined_call_operand.hbm [shape: s32[2], index: 0, kind: input, shape index: {}]   ;;  %s1187_s1 = inlined_call_operand.hbm [shape: bf16[16,128], index: 1, kind: input, shape index: {}]   ;;  %s1188_s2 = inlined_call_operand.hbm [shape: bf16[2,128,128], index: 2, kind: input, shape index: {}]   ;;  %s1189_s3 = inlined_call_operand.vmem [shape: f32[2,1,128], index: 3, kind: input, shape index: {}]   ;;  %s1190_s4 = inlined_call_operand.hbm [shape: f32[16,256], index: 4, kind: output, shape index: {}]  }
   0x1   :  { %1200 = sst [smem:[#allocation18_spill]] %s1187_s1  ;;  %s711_s17 = scalar_lea.hbm %s1186_s0, 16 }
   0x2   :  { %p712_p0 = scmp.ne.s32.totalorder %s1186_s0, %s711_s17  ;;  %p715_p1 = scmp.lt.u32.totalorder %s711_s17, %s1186_s0 }
   0x4   :  { %p717_p2 = pnand %p715_p1, %p712_p0 }
   0x6   :  { %720 = shalt.err (!%p717_p2)  }
   0x7   :  { %s893_s22 = smov [#allocation3]  }
   0x8   :  { %10 = dma.hbm_to_smem %s1186_s0, 16, %s893_s22, [#allocation2] }
   0x9   :  { %843 = dma.done.wait [#allocation2], 16 }
   0xa   :  { %844 = vsyncadd [#allocation2], 4294967280 }
   0xb   :  { %12 = sfence }
   0xc   :  { %13 = vsyncpa [#allocation5], 0 }
   0xd   :  { %14 = vsyncpa [#allocation8], 0 }
   0xe   :  { %16 = vsyncpa [#allocation8 + $0x1], 0 }
   0xf   :  { %17 = vsyncpa [#allocation6], 0 }
  0x10   :  { %19 = vsyncpa [#allocation6 + $0x1], 0  ;;  %s941_s25 = smov 0   ;;  %s943_s26 = smov 0  }
  0x11   :  { %s945_s27 = smov 0   ;;  %s947_s28 = smov 0  }
  0x12   :  { %s949_s29 = smov 0   ;;  %s951_s30 = smov 0  }
  0x13   :  { %s953_s0 = smov 0   ;;  %s955_s5 = smov 0  }
  0x14   :  { %s957_s6 = smov 0  }
  0x15 LB: > { %1201 = sst [smem:[#allocation16_spill]] %s887_s5  ;;  %s537_s7 = sadd.s32 4294967295, %s891_s6   ;;  %s891_s6 = sphi %s957_s6, %s25_s6   ;;  %s887_s5 = sphi %s955_s5, %s1220_s5   ;;  %s883_s0 = sphi %s953_s0, %s1219_s0   ;;  %s879_s30 = sphi %s951_s30, %s1226_s30   ;;  %s875_s29 = sphi %s949_s29, %s1225_s29   ;;  %s871_s28 = sphi %s947_s28, %s1224_s28   ;;  %s867_s27 = sphi %s945_s27, %s1223_s27   ;;  %s863_s26 = sphi %s943_s26, %s1222_s26   ;;  %s859_s25 = sphi %s941_s25, %s1221_s25  }
  0x16   : > { %s538_s8 = sadd.s32 4294967294, %s891_s6   ;;  %p94_p3 = scmp.ne.s32.totalorder %s875_s29, %s871_s28 }
  0x17   : > { %p987_p4 = scmp.eq.s32.totalorder %s537_s7, 0  ;;  %p151_p5 = scmp.ne.s32.totalorder %s867_s27, %s863_s26 }
  0x18   : > { %p152_p7 = scmp.eq.s32.totalorder %s537_s7, 1  ;;  %p157_p8 = scmp.ne.s32.totalorder %s863_s26, %s859_s25 }
  0x19   : > { %s1202_s9 = scalar_select %p987_p4, 1, 0 }
  0x1a   : > { %p995_p6 = por %p987_p4, %p94_p3  ;;  %p158_p9 = scmp.eq.s32.totalorder %s538_s8, 1 }
  0x1b   : > { %p1001_p10 = por %p152_p7, %p151_p5  ;;  %p539_p11 = scmp.ge.s32.totalorder %s891_s6, 1 }
  0x1c   : > { %s1203_s10 = scalar_select %p995_p6, 1, 0 }
  0x1d   : > { %s1204_s11 = scalar_select %p1001_p10, 1, 0 }
  0x1e   : > { %p1006_p12 = por %p158_p9, %p157_p8  ;;  %p165_p13 = scmp.lt.s32.totalorder %s891_s6, 3 }
  0x1f   : > { %s894_s14 = smov [#allocation4]   ;;  %s44_s17 = sadd.s32 1, %s887_s5 }
  0x20   : > { %s1205_s12 = scalar_select %p1006_p12, 1, 0 }
  0x21   : > { %p1011_p0 = pnand %p539_p11, %p165_p13  ;;  %s180_s15 = sshll.u32 %s894_s14, 4  ;;  %s181_s15 = int_to_ptr.vmem [resolvable:$true] %s180_s15 }
  0x22   : > { %s1208_s1 = sld [smem:[#allocation18_spill]] }
  0x23   : > { %s1206_s13 = scalar_select %p1011_p0, 1, 0 }
  0x24   : > { %p603_p1 = pneg %p1011_p0 }
  0x26   : > { %p1020_p3 = pnand %p603_p1, %p987_p4 }
  0x28   : > { %s721_s20 = scalar_lea.hbm %s1208_s1, 128  ;;  %p723_p7 = pneg %p1020_p3 }
  0x29   : > { %p722_p5 = scmp.ne.s32.totalorder %s1208_s1, %s721_s20  ;;  %p728_p11 = scmp.lt.u32.totalorder %s721_s20, %s1208_s1 }
  0x2b   : > { %p724_p8 = pnand %p723_p7, %p722_p5 }
  0x2d   : > { %p725_p9 = pneg %p724_p8 }
  0x2f   : > { %p730_p13 = pnand %p728_p11, %p725_p9 }
  0x31   : > { %733 = shalt.err (!%p730_p13)
}
  0x32   : > { %s734_s28 = scalar_lea.vmem %s181_s15, 128  ;;  %p742_p10 = scmp.lt.s32.totalorder %s181_s15, %s181_s15 }
  0x33   : > { %p735_p1 = scmp.ne.s32.totalorder %s181_s15, %s734_s28  ;;  %p743_p6 = scmp.lt.s32.totalorder %s734_s28, %s734_s28 }
  0x35   : > { %p737_p2 = pnand %p735_p1, %p723_p7  ;;  %p744_p4 = por %p743_p6, %p742_p10 }
  0x37   : > { %p738_p12 = pneg %p737_p2 }
  0x39   : > { %p745_p0 = pnand %p744_p4, %p738_p12 }
  0x3b   : > { %748 = shalt.err (!%p745_p0)
}
  0x3c   : > { %s1196_s7 = smov 64   ;;  %s1197_s8 = smov 4  }
  0x3d   : > { %606 = dma.hbm_to_vmem [thread:$0]  (!%p1020_p3), %s1208_s1, 128, %s181_s15, [#allocation5], %s1196_s7, %s1196_s7, %s1197_s8  }
  0x3e   : > { %p46_p4 = scmp.ge.s32.totalorder %s44_s17, 2  ;;  %s141_s19 = sadd.s32 1, %s867_s27 }
  0x3f   : > { %s74_s20 = sld [smem:[#allocation3 + %s887_s5]]  ;;  %p88_p6 = scmp.ne.s32.totalorder %s879_s30, %s875_s29 }
  0x40   : > { %s1228_s17 = smov (%p46_p4, %s44_s17), 0  ;;  %p89_p10 = scmp.eq.s32.totalorder %s891_s6, 0 }
  0x41   : > { %1209 = sst [smem:[#allocation17_spill]] %s1228_s17  ;;  %s137_s16 = ssub.s32 %s887_s5, %s1228_s17 }
  0x42   : > { %s75_s21 = sld [smem:[#allocation3 + %s1228_s17]]  ;;  %p139_p12 = scmp.eq.s32.totalorder %s137_s16, 0 }
  0x43   : > { %s194_s22 = sand.u32 1, %s879_s30   ;;  %p90_p0 = por %p89_p10, %p88_p6 }
  0x44   : > { %s1056_s23 = scalar_select %p139_p12, %s867_s27, %s141_s19  }
  0x45   : > { %s81_s24 = sadd.s32 1, %s879_s30  ;;  %p618_p2 = scmp.lt.s32.totalorder %s891_s6, 2 }
  0x46   : > { %s542_s28 = sshll.u32 %s194_s22, 6 }
  0x47   : > { %p1060_p5 = pnand %p618_p2, %p90_p0  ;;  %s198_s16 = scalar_lea.vmem [#allocation7], %s542_s28 }
  0x48   : > { %s76_s15 = ssub.s32 %s74_s20, %s75_s21  ;;  %s207_s1 = sshll.u32 %s198_s16, 4  ;;  %s1068_s1 = int_to_ptr.vmem [resolvable:$true] %s207_s1 }
  0x49   : > { %p79_p3 = scmp.eq.s32.totalorder %s76_s15, 0  ;;  %p751_p8 = pneg %p1060_p5 }
  0x4a   : > { %s595_s18 = scalar_select %p90_p0, [#allocation3], [#allocation10] }
  0x4b   : > { %s1065_s7 = scalar_select %p79_p3, %s879_s30, %s81_s24  }
  0x4c   : > { %s596_s8 = scalar_select %p90_p0, %s887_s5, 0 }
  0x4d   : > { %s1230_s18 = smov (!%p618_p2, %s595_s18), [#allocation11]  ;;  %s1075_s24 = scalar_lea.sflag [#allocation8], %s194_s22 }
  0x4e   : > { %s1232_s8 = smov (!%p618_p2, %s596_s8), 0 }
  0x4f   : > { %s199_s19 = sld [smem:[%s1230_s18 + %s1232_s8]]  ;;  %s754_s18 = scalar_lea.hbm %s1188_s2, 2048 }
  0x55   : > { %s563_s20 = sshll.u32 %s199_s19, 10 }
  0x56   : > { %s1073_s17 = scalar_lea.hbm %s1188_s2, %s563_s20 }
  0x57   : > { %s749_s5 = scalar_lea.hbm %s1073_s17, 1024  ;;  %p755_p13 = scmp.lt.u32.totalorder %s1073_s17, %s1188_s2 }
  0x58   : > { %p750_p7 = scmp.ne.s32.totalorder %s1073_s17, %s749_s5  ;;  %p756_p1 = scmp.lt.u32.totalorder %s754_s18, %s749_s5 }
  0x59   : > { %p758_p6 = scmp.lt.u32.totalorder %s749_s5, %s1073_s17 }
  0x5a   : > { %p752_p9 = pnand %p751_p8, %p750_p7  ;;  %p757_p4 = por %p756_p1, %p755_p13 }
  0x5c   : > { %p753_p11 = pneg %p752_p9  ;;  %p759_p10 = por %p758_p6, %p757_p4 }
  0x5e   : > { %p760_p12 = pnand %p759_p10, %p753_p11 }
  0x60   : > { %763 = shalt.err (!%p760_p12)
}
  0x61   : > { %s764_s22 = scalar_lea.vmem %s1068_s1, 1024  ;;  %s897_s20 = smov [#allocation7]  }
  0x62   : > { %p765_p0 = scmp.ne.s32.totalorder %s1068_s1, %s764_s22  ;;  %s769_s21 = sshll.u32 %s897_s20, 4  ;;  %s770_s21 = int_to_ptr.vmem [resolvable:$false] %s769_s21 }
  0x63   : > { %s771_s15 = scalar_lea.vmem %s770_s21, 2048  ;;  %p772_p7 = scmp.lt.s32.totalorder %s1068_s1, %s770_s21 }
  0x64   : > { %p767_p2 = pnand %p765_p0, %p751_p8  ;;  %p773_p9 = scmp.lt.s32.totalorder %s771_s15, %s764_s22 }
  0x66   : > { %p768_p3 = pneg %p767_p2  ;;  %p774_p13 = por %p773_p9, %p772_p7 }
  0x68   : > { %p775_p1 = pnand %p774_p13, %p768_p3 }
  0x6a   : > { %778 = shalt.err (!%p775_p1)
}
  0x6b   : > { %s1211_s5 = smov 4   ;;  %s1212_s8 = smov 64  }
  0x6c   : > { %612 = dma.hbm_to_vmem [thread:$0]  (!%p1060_p5), %s1073_s17, 1024, %s1068_s1, %s1075_s24, %s1212_s8, %s1212_s8, %s1211_s5  }
  0x6d   : > { %p1213_p8 = scmp.ne.s32.totalorder %s1206_s13, 0 }
  0x6e   : > { %p1214_p11 = scmp.ne.s32.totalorder (!%p1213_p8), %s1202_s9, 0 }
  0x6f   : > { %230 = sbr.rel (%p1213_p8) target bundleno = 388 (0x184), region = 32 }
  0x76   : > { %846 = dma.done.wait (%p1214_p11), [#allocation5], 128  }
  0x77   : > { %848 = vsyncadd (%p1214_p11), [#allocation5], 4294967168  ;;  %s236_s28 = sand.u32 1, %s875_s29   ;;  %p1215_p4 = scmp.ne.s32.totalorder %s1203_s10, 0 }
  0x78   : > { %s547_s14 = sshll.u32 %s236_s28, 6  ;;  %s237_s18 = scalar_lea.sflag [#allocation8], %s236_s28 }
  0x79   : > { %s240_s19 = scalar_lea.vmem [#allocation7], %s547_s14 }
  0x7a   : > { %850 = dma.done.wait (%p1215_p4), %s237_s18, 1024  }
  0x7b   : > { %852 = vsyncadd (%p1215_p4), %s237_s18, 4294966272  ;;  %v898_v0 = vmov 0.0   ;;  %vm899_vm0 = vmmov 0   ;;  %v702_v1 = vld [vmem:[%s240_s19] sm:$0xff]   ;;  %v703_v2 = vld [vmem:[%s240_s19 + $0x8] sm:$0xff]   ;;  %s272_s1 = sld [smem:[#allocation3 + %s883_s0]] }
  0x7c   : > { %573 = vmatprep.subr.bf16.mxu0 %v898_v0  ;;  %589 = vmatprep.mubr.msk.bf16.mxu0 %vm899_vm0, %v898_v0  ;;  %v704_v3 = vld [vmem:[%s240_s19 + $0x10] sm:$0xff]   ;;  %v705_v4 = vld [vmem:[%s240_s19 + $0x18] sm:$0xff]   ;;  %v706_v5 = vld [vmem:[%s240_s19 + $0x20] sm:$0xff]   ;;  %s267_s9 = sand.u32 1, %s863_s26   ;;  %s560_s20 = sshll.u32 %s883_s0, 7 }
  0x7d   : > { %574 = vmatpush3.bf16.msra.mxu0 %v702_v1  ;;  %v707_v6 = vld [vmem:[%s240_s19 + $0x28] sm:$0xff]   ;;  %v708_v7 = vld [vmem:[%s240_s19 + $0x30] sm:$0xff]   ;;  %v709_v8 = vld [vmem:[%s240_s19 + $0x38] sm:$0xff]   ;;  %s548_s10 = sshll.u32 %s267_s9, 4  ;;  %s1128_s5 = scalar_lea.hbm %s1190_s4, %s560_s20 }
  0x7e   : > { %575 = vmatprep.subr.bf16.mxu0 %v898_v0  ;;  %v710_v9 = vld [vmem:[#allocation4] sm:$0xff]   ;;  %s269_s16 = scalar_lea.vmem [#allocation9], %s548_s10  ;;  %s1130_s8 = scalar_lea.sflag [#allocation6], %s267_s9 }
  0x7f   : > { %s422_s22 = sshll.u32 %s269_s16, 4  ;;  %p1216_p10 = scmp.ne.s32.totalorder %s1204_s11, 0  ;;  %s1123_s22 = int_to_ptr.vmem [resolvable:$true] %s422_s22 }
  0x80   : > { %s779_s0 = scalar_lea.vmem %s1123_s22, 256  ;;  %s900_s28 = smov [#allocation9]  }
  0x81   : > { %576 = vmatpush3.bf16.msra.mxu0 %v703_v2  ;;  %p273_p5 = scmp.lt.s32.totalorder %s272_s1, 1  ;;  %p780_p6 = scmp.ne.s32.totalorder %s1123_s22, %s779_s0 }
  0x82   : > { %577 = vmatprep.subr.bf16.mxu0 %v898_v0  ;;  %s783_s14 = sshll.u32 %s900_s28, 4  ;;  %s784_s14 = int_to_ptr.vmem [resolvable:$false] %s783_s14 }
  0x83   : > { %s1234_s1 = smov (!%p273_p5, %s272_s1), 1  ;;  %p781_p12 = pnand %p780_p6, %p1216_p10 }
  0x84   : > { %s278_s24 = scalar_lea.vmem %s1189_s3, %s1234_s1  ;;  %s785_s18 = scalar_lea.vmem %s784_s14, 512 }
  0x85   : > { %578 = vmatpush3.bf16.msra.mxu0 %v704_v3  ;;  %v549_v10 = vld [vmem:[%s278_s24] ss:$0 sm:$0xff]  ;;  %p782_p0 = pneg %p781_p12  ;;  %p786_p2 = scmp.lt.s32.totalorder %s1123_s22, %s784_s14 }
  0x86   : > { %579 = vmatprep.subr.bf16.mxu0 %v898_v0  ;;  %p787_p3 = scmp.lt.s32.totalorder %s785_s18, %s779_s0 }
  0x88   : > { %p788_p7 = por %p787_p3, %p786_p2 }
  0x89   : > { %580 = vmatpush3.bf16.msra.mxu0 %v705_v4 }
  0x8a   : > { %581 = vmatprep.subr.bf16.mxu0 %v898_v0  ;;  %p789_p9 = pnand %p788_p7, %p782_p0 }
  0x8d   : > { %582 = vmatpush3.bf16.msra.mxu0 %v706_v5 }
  0x8e   : > { %583 = vmatprep.subr.bf16.mxu0 %v898_v0 }
  0x91   : > { %584 = vmatpush3.bf16.msra.mxu0 %v707_v6 }
  0x92   : > { %585 = vmatprep.subr.bf16.mxu0 %v898_v0 }
  0x95   : > { %586 = vmatpush3.bf16.msra.mxu0 %v708_v7 }
  0x96   : > { %587 = vmatprep.subr.bf16.mxu0 %v898_v0 }
  0x99   : > { %588 = vmatpush3.bf16.msra.mxu0 %v709_v8 }
  0x9c   : > { %590 = vmatmul.mubr.bf16.vlgmr.msra.gmra.mrb[0].mxu0 %v710_v9 }
 0x16f   : > { %v396_v11 = vpop.f32.mrb[0].mxu0 }
 0x170   : > { %v397_v12 = vadd.f32 %v549_v10, %v396_v11  ;;  %v591_v13 = vpop.f32.mrb[1].mxu0 }
 0x171   : > { %v399_v14 = vpop.f32.mrb[2].mxu0 }
 0x172   : > { %403 = vst [vmem:[%s269_s16] sm:$0xff] %v397_v12  ;;  %v400_v15 = vadd.f32 %v549_v10, %v399_v14  ;;  %v592_v16 = vpop.f32.mrb[3].mxu0 }
 0x174   : > { %404 = vst [vmem:[%s269_s16 + $0x8] sm:$0xff] %v400_v15 }
 0x175   : > { %792 = shalt.err (!%p789_p9)
}
 0x176   : > { %s793_s19 = scalar_lea.hbm %s1128_s5, 256  ;;  %s797_s10 = scalar_lea.hbm %s1190_s4, 512 }
 0x177   : > { %p794_p13 = scmp.ne.s32.totalorder %s1128_s5, %s793_s19  ;;  %p798_p11 = scmp.lt.u32.totalorder %s1128_s5, %s1190_s4 }
 0x178   : > { %p799_p4 = scmp.lt.u32.totalorder %s797_s10, %s793_s19  ;;  %p801_p6 = scmp.lt.u32.totalorder %s793_s19, %s1128_s5 }
 0x179   : > { %p795_p1 = pnand %p794_p13, %p1216_p10 }
 0x17a   : > { %p800_p5 = por %p799_p4, %p798_p11 }
 0x17b   : > { %p796_p8 = pneg %p795_p1 }
 0x17c   : > { %p802_p12 = por %p801_p6, %p800_p5 }
 0x17e   : > { %p803_p0 = pnand %p802_p12, %p796_p8 }
 0x180   : > { %806 = shalt.err (!%p803_p0)
}
 0x181   : > { %s901_s24 = smov 128   ;;  %s902_s16 = smov 256  }
 0x182   : > { %s903_s20 = smov 8  }
 0x183   : > { %601 = dma.vmem_to_hbm [thread:$0]  (%p1216_p10), %s1123_s22, 256, %s1128_s5, %s1130_s8, %s901_s24, %s902_s16, %s903_s20  }
 0x184 PF: > { %s437_s21 = sand.u32 1, %s859_s25   ;;  %p1217_p2 = scmp.ne.s32.totalorder %s1205_s12, 0 }
 0x185   : > { %p1218_p3 = scmp.ge.s32.totalorder %s891_s6, 2  ;;  %s438_s15 = scalar_lea.sflag [#allocation6], %s437_s21 }
 0x187   : > { %p614_p7 = pnand %p1218_p3, %p1217_p2 }
 0x189   : > { %854 = dma.done.wait (!%p614_p7), %s438_s15, 256  }
 0x18a   : > { %856 = vsyncadd (!%p614_p7), %s438_s15, 4294967040  ;;  %s25_s6 = sadd.s32 1, %s891_s6   ;;  %s1219_s0 = sld [smem:[#allocation16_spill]] }
 0x18b   : > { %p22_p9 = scmp.ge.s32.totalorder %s25_s6, 4   ;;  %s1220_s5 = sld [smem:[#allocation17_spill]] }
 0x18c   : > { %s1221_s25 = smov %s863_s26  ;;  %s1222_s26 = smov %s867_s27 }
 0x18d   : > { %s1223_s27 = smov %s1056_s23  ;;  %s1224_s28 = smov %s875_s29 }
 0x18e   : > { %s1225_s29 = smov %s879_s30  ;;  %s1226_s30 = smov %s1065_s7 }
 0x18f   :  { %24 = sbr.rel (!%p22_p9) target bundleno = 21 (0x15), region = 86 }
 0x196   :  { %443 = vsyncpa [#allocation5], 1 }
 0x197   :  { %445 = vsyncpa [#allocation5 + $0x1], 1 }
 0x198   :  { %446 = vsyncpa [#allocation8], 1 }
 0x199   :  { %448 = vsyncpa [#allocation8 + $0x1], 1 }
 0x19a   :  { %449 = vsyncpa [#allocation6], 1 }
 0x19b   :  { %451 = vsyncpa [#allocation6 + $0x1], 1 }

</bundles_post_ra>
